<compile_context>
chip_gen: v5e
topology: v5e:2x2
jax: 0.10.0
libtpu: 0.0.40
codegen_flags: <defaults>
</compile_context>

<pallas_src>
import functools

import jax
import jax.numpy as jnp
import numpy as np
from jax.experimental import pallas as pl
from jax.experimental.pallas import tpu as pltpu

V_THRESH = 30.0


def _lif_kernel(w_hbm_ref, const_ref, i_ext_ref,
                v_out_ref, soft_out_ref, s_out_ref,
                w_scr, dma_sem, v_scr, s_scr,
                *, tb, t_steps, needs_mask):
    """Runs `tb` LIF timesteps per grid step; state carried in VMEM scratch."""
    tt = pl.program_id(0)

    # One-time setup: DMA W_syn^T (bf16) into its single resident VMEM buffer
    # and initialize the carried state from the packed constants tile.
    @pl.when(tt == 0)
    def _():
        cp = pltpu.make_async_copy(w_hbm_ref, w_scr, dma_sem)
        cp.start()
        cp.wait()
        v_scr[...] = const_ref[5:6, :]      # v0
        s_scr[...] = const_ref[6:7, :]      # s0

    cst = const_ref[...]                    # (8, N) packed constants
    e_l     = cst[0:1, :]
    decay_v = cst[1:2, :]                   # 1 - 1/tau_m
    b       = cst[2:3, :]                   # norm_R / tau_m
    c       = cst[3:4, :]                   # E_L/tau_m + 0.15*norm_R/tau_m
    decay_s = cst[4:5, :]                   # 1 - 1/tau_s

    v = v_scr[...]                          # (1, N) f32
    s = s_scr[...]                          # (1, N) f32

    # Static (fully unrolled) inner time loop: all indices are compile-time
    # constants, so loads/stores are static sublane slices.
    for i in range(tb):
        # I_syn = W_syn @ s, lane-dense as s_row @ W_syn^T; bf16 x bf16 -> f32.
        i_syn = jnp.dot(s.astype(jnp.bfloat16), w_scr[...],
                        preferred_element_type=jnp.float32)
        i_drive = i_syn + i_ext_ref[pl.ds(i, 1), :]

        v_next = v * decay_v + c + b * i_drive
        spiked = v_next >= V_THRESH

        soft_out_ref[pl.ds(i, 1), :] = jax.nn.sigmoid(v_next - V_THRESH)

        v_new = jnp.where(spiked, e_l, v_next)
        s_new = jnp.where(spiked, 1.0, s * decay_s)

        if needs_mask:
            # Padded trailing timesteps: freeze the state (outputs for those
            # rows are sliced away by the wrapper).
            valid = (tt * tb + i) < t_steps
            v_new = jnp.where(valid, v_new, v)
            s_new = jnp.where(valid, s_new, s)

        v_out_ref[pl.ds(i, 1), :] = v_new
        v = v_new
        s = s_new

    v_scr[...] = v
    s_scr[...] = s

    # Final hidden state is only an output once, on the last grid step.
    @pl.when(tt == pl.num_programs(0) - 1)
    def _():
        s_out_ref[...] = s


@functools.partial(jax.jit, static_argnames=("tb",))
def lif_rollout(w, neuron_types, e_l, tau_m, tau_s, norm_r, v0, s0, i_ext, *, tb=16):
    """Runs T LIF steps.

    Args:
      w:            (N, N) f32 raw weights.
      neuron_types: (N,)   f32 (+1 excitatory / -1 inhibitory).
      e_l, tau_m, tau_s, norm_r, v0, s0: (N,) f32 per-neuron vectors.
      i_ext:        (T, N) f32 external current per timestep.
      tb:           timesteps processed per grid step (static).
    Returns:
      v_trace (T, N), soft_spiked_trace (T, N), s_final (1, N).
    """
    n = w.shape[0]
    t_steps = i_ext.shape[0]

    # ---- padding (lane-dense N, sublane-dense time tiles) ----
    n_pad = max(128, ((n + 127) // 128) * 128)
    tb = max(1, min(int(tb), t_steps))
    t_pad = ((t_steps + tb - 1) // tb) * tb
    needs_mask = (t_pad != t_steps)

    def pad_vec(x, fill):
        return jnp.full((n_pad,), fill, jnp.float32).at[:n].set(
            jnp.asarray(x, jnp.float32).reshape(-1))

    # W_syn = mask * w * neuron_types  (constant across timesteps -> built once,
    # padded with zeros so padded lanes contribute exactly 0).
    w_p = jnp.zeros((n_pad, n_pad), jnp.float32).at[:n, :n].set(
        jnp.asarray(w, jnp.float32))
    nt_p = pad_vec(neuron_types, 0.0)
    mask = 1.0 - jnp.eye(n_pad, dtype=jnp.float32)
    w_syn = mask * w_p * nt_p[None, :]
    w_syn_t = w_syn.T.astype(jnp.bfloat16)                 # (N, N) bf16, contract s over rows

    # Folded per-step affine constants (benign fills for padded lanes: no NaNs).
    e_l_p   = pad_vec(e_l, 0.0)
    tau_m_p = pad_vec(tau_m, 1.0)
    tau_s_p = pad_vec(tau_s, 1.0)
    norm_r_p = pad_vec(norm_r, 0.0)
    v0_p = pad_vec(v0, 0.0)
    s0_p = pad_vec(s0, 0.0)

    inv_tau_m = 1.0 / tau_m_p
    decay_v = 1.0 - inv_tau_m
    b = norm_r_p * inv_tau_m
    c = e_l_p * inv_tau_m + 0.15 * b
    decay_s = 1.0 - 1.0 / tau_s_p

    const_pack = jnp.stack(
        [e_l_p, decay_v, b, c, decay_s, v0_p, s0_p,
         jnp.zeros((n_pad,), jnp.float32)], axis=0)        # (8, N)

    i_ext_p = jnp.zeros((t_pad, n_pad), jnp.float32).at[:t_steps, :n].set(
        jnp.asarray(i_ext, jnp.float32))

    # ---- specs ----
    const_spec = pl.BlockSpec((8, n_pad), lambda tt_: (0, 0))     # VMEM resident
    step_spec = pl.BlockSpec((tb, n_pad), lambda tt_: (tt_, 0))   # per time-tile
    sfin_spec = pl.BlockSpec((1, n_pad), lambda tt_: (0, 0))

    out_shapes = (
        jax.ShapeDtypeStruct((t_pad, n_pad), jnp.float32),        # v trace
        jax.ShapeDtypeStruct((t_pad, n_pad), jnp.float32),        # soft-spike trace
        jax.ShapeDtypeStruct((1, n_pad), jnp.float32),            # final s
    )

    # VMEM budget: single-buffered bf16 W + small double-buffered I/O + headroom.
    # Cap at 48 MiB (safely below v7x's 64 MiB/TC; well below v5e/v6e's 128 MiB).
    w_bytes = n_pad * n_pad * 2
    io_bytes = (2 * 8 + 6 * tb + 4) * n_pad * 4
    vmem_limit = int(min(48 * (1 << 20), w_bytes + io_bytes + (8 << 20)))

    kernel = functools.partial(_lif_kernel, tb=tb, t_steps=t_steps,
                               needs_mask=needs_mask)

    v_tr, soft_tr, s_fin = pl.pallas_call(
        kernel,
        out_shape=out_shapes,
        grid_spec=pltpu.PrefetchScalarGridSpec(
            num_scalar_prefetch=0,
            grid=(t_pad // tb,),
            in_specs=[pl.BlockSpec(memory_space=pl.ANY),    # W_syn^T stays in HBM, copied once
                      const_spec,                           # packed constants
                      step_spec],                           # I_ext time tile
            out_specs=(step_spec, step_spec, sfin_spec),
            scratch_shapes=[pltpu.VMEM((n_pad, n_pad), jnp.bfloat16),  # resident W (single buffer)
                            pltpu.SemaphoreType.DMA,                   # W copy semaphore
                            pltpu.VMEM((1, n_pad), jnp.float32),       # v carry
                            pltpu.VMEM((1, n_pad), jnp.float32)],      # s carry
        ),
        compiler_params=pltpu.CompilerParams(
            dimension_semantics=("arbitrary",),   # sequential recurrence over time tiles
            vmem_limit_bytes=vmem_limit),
    )(w_syn_t, const_pack, i_ext_p)

    return v_tr[:t_steps, :n], soft_tr[:t_steps, :n], s_fin[:, :n]


# ---------------------------------------------------------------------------
# Pure-numpy reference of LIF.forward (torch math), mirroring the kernel's
# bf16 rounding of the matvec operands so tolerances stay tight.
# ---------------------------------------------------------------------------
def _bf16_round(x):
    return np.asarray(
        jnp.asarray(np.asarray(x, np.float32), jnp.bfloat16).astype(jnp.float32))


def _reference_rollout(w, mask, nt_mat, e_l, tau_m, tau_s, norm_r, v, s, i_ext_seq):
    w_syn = _bf16_round(mask * w * nt_mat)
    v_tr, soft_tr = [], []
    for i_ext in i_ext_seq:
        i_syn = w_syn @ _bf16_round(s)
        i_tot = i_syn + i_ext + 0.15
        dv = ((e_l - v) + norm_r * i_tot) / tau_m
        v_next = v + dv
        spiked = (v_next >= V_THRESH).astype(np.float32)
        not_spiked = (spiked - 1.0) / -1.0
        soft = (1.0 / (1.0 + np.exp(-(v_next.astype(np.float64) - V_THRESH)))
                ).astype(np.float32)
        v = spiked * e_l + not_spiked * v_next
        ds = s - s / tau_s
        s = spiked + not_spiked * ds
        v_tr.append(v.copy())
        soft_tr.append(soft.copy())
    return np.stack(v_tr), np.stack(soft_tr), s


if __name__ == "__main__":
    N = 4           # module default population size
    T = 8           # recurrent timesteps
    w_mean, w_var = 0.1, 0.15
    E_L_val, tau_m_val, tau_s_val = -55.0, 2.8, 3.2
    neuron_types = jnp.asarray([1.0, 1.0, -1.0, -1.0], jnp.float32)

    key = jax.random.PRNGKey(0)
    k_w, k_i = jax.random.split(key)

    # rand_ws = abs(w_mean - w_var + 2*w_var*U(0,1))
    rand_ws = jnp.abs(
        w_mean - w_var + 2.0 * w_var * jax.random.uniform(k_w, (N, N), jnp.float32))

    E_L = jnp.clip(jnp.full((N,), E_L_val, jnp.float32), -80.0, -35.0)
    tau_m = jnp.clip(jnp.full((N,), tau_m_val, jnp.float32), 1.5, 8.0)
    tau_s = jnp.clip(jnp.full((N,), tau_s_val, jnp.float32), 1.0, 12.0)
    norm_R = 1.1 * (V_THRESH - jnp.full((N,), E_L_val, jnp.float32))

    # State after reset(): v = E_L, s = 0.
    v0 = E_L
    s0 = jnp.zeros((N,), jnp.float32)

    # External input current per timestep.
    I_ext = jax.random.uniform(k_i, (T, N), jnp.float32) * 2.0

    v_tr, soft_tr, s_fin = lif_rollout(
        rand_ws, neuron_types, E_L, tau_m, tau_s, norm_R, v0, s0, I_ext, tb=8)
    jax.block_until_ready((v_tr, soft_tr, s_fin))

    # Validate against a pure-numpy reference of the torch forward.
    mask_np = np.ones((N, N), np.float32) - np.eye(N, dtype=np.float32)
    nt_np = np.asarray(neuron_types)[None, :] * np.ones((N, N), np.float32)
    v_ref, soft_ref, s_ref = _reference_rollout(
        np.asarray(rand_ws, np.float32), mask_np, nt_np,
        np.asarray(E_L, np.float32), np.asarray(tau_m, np.float32),
        np.asarray(tau_s, np.float32), np.asarray(norm_R, np.float32),
        np.asarray(v0, np.float32), np.asarray(s0, np.float32),
        np.asarray(I_ext, np.float32))

    assert np.allclose(np.asarray(v_tr), v_ref, rtol=2e-3, atol=2e-3)
    assert np.allclose(np.asarray(soft_tr), soft_ref, rtol=2e-3, atol=2e-3)
    assert np.allclose(np.asarray(s_fin)[0], s_ref, rtol=2e-3, atol=2e-3)

    print("KERNEL_OK")
</pallas_src>

<mosaic_0001>
module attributes {stable_mosaic.version = 11 : i64} {
  func.func @_lif_kernel(%arg0: i32, %arg1: memref<128x128xbf16, #tpu.memory_space<any>>, %arg2: memref<8x128xf32, #tpu.memory_space<vmem>>, %arg3: memref<8x128xf32, #tpu.memory_space<vmem>>, %arg4: memref<8x128xf32, #tpu.memory_space<vmem>>, %arg5: memref<8x128xf32, #tpu.memory_space<vmem>>, %arg6: memref<1x128xf32, #tpu.memory_space<vmem>>, %arg7: memref<128x128xbf16, #tpu.memory_space<vmem>>, %arg8: memref<!tpu.dma_semaphore, #tpu.memory_space<semaphore_mem>>, %arg9: memref<1x128xf32, #tpu.memory_space<vmem>>, %arg10: memref<1x128xf32, #tpu.memory_space<vmem>>) attributes {dimension_semantics = [#tpu.dimension_semantics<arbitrary>], iteration_bounds = array<i64: 1>, scalar_prefetch = 0 : i64, scratch_operands = 4 : i64, tpu.core_type = #tpu.core_type<tc>, window_params = [{}, {pipeline_mode = #tpu.pipeline_mode<synchronous>, transform_indices = @transform_1, window_bounds = array<i64: 8, 128>}, {transform_indices = @transform_2, window_bounds = array<i64: 8, 128>}, {transform_indices = @transform_3, window_bounds = array<i64: 8, 128>}, {transform_indices = @transform_4, window_bounds = array<i64: 8, 128>}, {pipeline_mode = #tpu.pipeline_mode<synchronous>, transform_indices = @transform_5, window_bounds = array<i64: 1, 128>}]} {
    %c0_i32 = arith.constant 0 : i32
    %0 = arith.cmpi eq, %arg0, %c0_i32 : i32
    %1 = arith.extui %0 : i1 to i32
    %c0_i32_0 = arith.constant 0 : i32
    %2 = arith.cmpi ne, %1, %c0_i32_0 : i32
    scf.if %2 {
      tpu.enqueue_dma source(%arg1 : memref<128x128xbf16, #tpu.memory_space<any>>) target(%arg7 : memref<128x128xbf16, #tpu.memory_space<vmem>>) target_semaphore(%arg8 : memref<!tpu.dma_semaphore, #tpu.memory_space<semaphore_mem>>)
      tpu.wait_dma2 semaphore(%arg8 : memref<!tpu.dma_semaphore, #tpu.memory_space<semaphore_mem>>) src(%arg1 : memref<128x128xbf16, #tpu.memory_space<any>>) dst(%arg7 : memref<128x128xbf16, #tpu.memory_space<vmem>>)
      %c5_108 = arith.constant 5 : index
      %c0_109 = arith.constant 0 : index
      %208 = vector.load %arg2[%c5_108, %c0_109] : memref<8x128xf32, #tpu.memory_space<vmem>>, vector<1x128xf32>
      %c0_110 = arith.constant 0 : index
      %c0_111 = arith.constant 0 : index
      %209 = vector.load %arg9[%c0_110, %c0_111] : memref<1x128xf32, #tpu.memory_space<vmem>>, vector<1x128xf32>
      tpu.vector_store %arg9[%c0_110, %c0_111], %208 {strides = array<i32>} : memref<1x128xf32, #tpu.memory_space<vmem>>, vector<1x128xf32>,
      %c6_112 = arith.constant 6 : index
      %c0_113 = arith.constant 0 : index
      %210 = vector.load %arg2[%c6_112, %c0_113] : memref<8x128xf32, #tpu.memory_space<vmem>>, vector<1x128xf32>
      %c0_114 = arith.constant 0 : index
      %c0_115 = arith.constant 0 : index
      %211 = vector.load %arg10[%c0_114, %c0_115] : memref<1x128xf32, #tpu.memory_space<vmem>>, vector<1x128xf32>
      tpu.vector_store %arg10[%c0_114, %c0_115], %210 {strides = array<i32>} : memref<1x128xf32, #tpu.memory_space<vmem>>, vector<1x128xf32>,
    } else {
    }
    %c0 = arith.constant 0 : index
    %c0_1 = arith.constant 0 : index
    %3 = vector.load %arg2[%c0, %c0_1] : memref<8x128xf32, #tpu.memory_space<vmem>>, vector<8x128xf32>
    %4 = vector.extract_strided_slice %3 {offsets = [0, 0], sizes = [1, 128], strides = [1, 1]} : vector<8x128xf32> to vector<1x128xf32>
    %5 = vector.extract_strided_slice %3 {offsets = [1, 0], sizes = [1, 128], strides = [1, 1]} : vector<8x128xf32> to vector<1x128xf32>
    %6 = vector.extract_strided_slice %3 {offsets = [2, 0], sizes = [1, 128], strides = [1, 1]} : vector<8x128xf32> to vector<1x128xf32>
    %7 = vector.extract_strided_slice %3 {offsets = [3, 0], sizes = [1, 128], strides = [1, 1]} : vector<8x128xf32> to vector<1x128xf32>
    %8 = vector.extract_strided_slice %3 {offsets = [4, 0], sizes = [1, 128], strides = [1, 1]} : vector<8x128xf32> to vector<1x128xf32>
    %c0_2 = arith.constant 0 : index
    %c0_3 = arith.constant 0 : index
    %9 = vector.load %arg9[%c0_2, %c0_3] : memref<1x128xf32, #tpu.memory_space<vmem>>, vector<1x128xf32>
    %c0_4 = arith.constant 0 : index
    %c0_5 = arith.constant 0 : index
    %10 = vector.load %arg10[%c0_4, %c0_5] : memref<1x128xf32, #tpu.memory_space<vmem>>, vector<1x128xf32>
    %11 = arith.truncf %10 : vector<1x128xf32> to vector<1x128xbf16>
    %c0_6 = arith.constant 0 : index
    %c0_7 = arith.constant 0 : index
    %12 = vector.load %arg7[%c0_6, %c0_7] : memref<128x128xbf16, #tpu.memory_space<vmem>>, vector<128x128xbf16>
    %cst = arith.constant dense<0.000000e+00> : vector<1x128xf32>
    %13 = tpu.matmul %11, %12, %cst {dimension_numbers = #tpu.dot_dimension_numbers<[1], [0], [0], [1], [0, 0, 1, 1], [], []>} : vector<1x128xbf16>, vector<128x128xbf16>, vector<1x128xf32> -> vector<1x128xf32>
    %c0_8 = arith.constant 0 : index
    %c0_9 = arith.constant 0 : index
    %14 = vector.load %arg3[%c0_8, %c0_9] : memref<8x128xf32, #tpu.memory_space<vmem>>, vector<1x128xf32>
    %15 = arith.addf %13, %14 : vector<1x128xf32>
    %16 = arith.mulf %9, %5 : vector<1x128xf32>
    %17 = arith.addf %16, %7 : vector<1x128xf32>
    %18 = arith.mulf %6, %15 : vector<1x128xf32>
    %19 = arith.addf %17, %18 : vector<1x128xf32>
    %cst_10 = arith.constant 3.000000e+01 : f32
    %20 = vector.broadcast %cst_10 : f32 to vector<1x128xf32>
    %21 = arith.cmpf oge, %19, %20 : vector<1x128xf32>
    %cst_11 = arith.constant 3.000000e+01 : f32
    %22 = vector.broadcast %cst_11 : f32 to vector<1x128xf32>
    %23 = arith.subf %19, %22 : vector<1x128xf32>
    %24 = arith.negf %23 : vector<1x128xf32>
    %25 = math.exp %24 : vector<1x128xf32>
    %cst_12 = arith.constant 1.000000e+00 : f32
    %26 = vector.broadcast %cst_12 : f32 to vector<1x128xf32>
    %27 = arith.addf %26, %25 : vector<1x128xf32>
    %28 = arith.divf %26, %27 : vector<1x128xf32>
    %c0_13 = arith.constant 0 : index
    %c0_14 = arith.constant 0 : index
    %29 = vector.load %arg5[%c0_13, %c0_14] : memref<8x128xf32, #tpu.memory_space<vmem>>, vector<1x128xf32>
    tpu.vector_store %arg5[%c0_13, %c0_14], %28 {strides = array<i32>} : memref<8x128xf32, #tpu.memory_space<vmem>>, vector<1x128xf32>,
    %30 = arith.select %21, %4, %19 : vector<1x128xi1>, vector<1x128xf32>
    %31 = arith.mulf %10, %8 : vector<1x128xf32>
    %cst_15 = arith.constant 1.000000e+00 : f32
    %32 = vector.broadcast %cst_15 : f32 to vector<1x128xf32>
    %33 = arith.select %21, %32, %31 : vector<1x128xi1>, vector<1x128xf32>
    %c0_16 = arith.constant 0 : index
    %c0_17 = arith.constant 0 : index
    %34 = vector.load %arg4[%c0_16, %c0_17] : memref<8x128xf32, #tpu.memory_space<vmem>>, vector<1x128xf32>
    tpu.vector_store %arg4[%c0_16, %c0_17], %30 {strides = array<i32>} : memref<8x128xf32, #tpu.memory_space<vmem>>, vector<1x128xf32>,
    %35 = arith.truncf %33 : vector<1x128xf32> to vector<1x128xbf16>
    %c0_18 = arith.constant 0 : index
    %c0_19 = arith.constant 0 : index
    %36 = vector.load %arg7[%c0_18, %c0_19] : memref<128x128xbf16, #tpu.memory_space<vmem>>, vector<128x128xbf16>
    %cst_20 = arith.constant dense<0.000000e+00> : vector<1x128xf32>
    %37 = tpu.matmul %35, %36, %cst_20 {dimension_numbers = #tpu.dot_dimension_numbers<[1], [0], [0], [1], [0, 0, 1, 1], [], []>} : vector<1x128xbf16>, vector<128x128xbf16>, vector<1x128xf32> -> vector<1x128xf32>
    %c1 = arith.constant 1 : index
    %c0_21 = arith.constant 0 : index
    %38 = vector.load %arg3[%c1, %c0_21] : memref<8x128xf32, #tpu.memory_space<vmem>>, vector<1x128xf32>
    %39 = arith.addf %37, %38 : vector<1x128xf32>
    %40 = arith.mulf %30, %5 : vector<1x128xf32>
    %41 = arith.addf %40, %7 : vector<1x128xf32>
    %42 = arith.mulf %6, %39 : vector<1x128xf32>
    %43 = arith.addf %41, %42 : vector<1x128xf32>
    %cst_22 = arith.constant 3.000000e+01 : f32
    %44 = vector.broadcast %cst_22 : f32 to vector<1x128xf32>
    %45 = arith.cmpf oge, %43, %44 : vector<1x128xf32>
    %cst_23 = arith.constant 3.000000e+01 : f32
    %46 = vector.broadcast %cst_23 : f32 to vector<1x128xf32>
    %47 = arith.subf %43, %46 : vector<1x128xf32>
    %48 = arith.negf %47 : vector<1x128xf32>
    %49 = math.exp %48 : vector<1x128xf32>
    %cst_24 = arith.constant 1.000000e+00 : f32
    %50 = vector.broadcast %cst_24 : f32 to vector<1x128xf32>
    %51 = arith.addf %50, %49 : vector<1x128xf32>
    %52 = arith.divf %50, %51 : vector<1x128xf32>
    %c1_25 = arith.constant 1 : index
    %c0_26 = arith.constant 0 : index
    %53 = vector.load %arg5[%c1_25, %c0_26] : memref<8x128xf32, #tpu.memory_space<vmem>>, vector<1x128xf32>
    tpu.vector_store %arg5[%c1_25, %c0_26], %52 {strides = array<i32>} : memref<8x128xf32, #tpu.memory_space<vmem>>, vector<1x128xf32>,
    %54 = arith.select %45, %4, %43 : vector<1x128xi1>, vector<1x128xf32>
    %55 = arith.mulf %33, %8 : vector<1x128xf32>
    %cst_27 = arith.constant 1.000000e+00 : f32
    %56 = vector.broadcast %cst_27 : f32 to vector<1x128xf32>
    %57 = arith.select %45, %56, %55 : vector<1x128xi1>, vector<1x128xf32>
    %c1_28 = arith.constant 1 : index
    %c0_29 = arith.constant 0 : index
    %58 = vector.load %arg4[%c1_28, %c0_29] : memref<8x128xf32, #tpu.memory_space<vmem>>, vector<1x128xf32>
    tpu.vector_store %arg4[%c1_28, %c0_29], %54 {strides = array<i32>} : memref<8x128xf32, #tpu.memory_space<vmem>>, vector<1x128xf32>,
    %59 = arith.truncf %57 : vector<1x128xf32> to vector<1x128xbf16>
    %c0_30 = arith.constant 0 : index
    %c0_31 = arith.constant 0 : index
    %60 = vector.load %arg7[%c0_30, %c0_31] : memref<128x128xbf16, #tpu.memory_space<vmem>>, vector<128x128xbf16>
    %cst_32 = arith.constant dense<0.000000e+00> : vector<1x128xf32>
    %61 = tpu.matmul %59, %60, %cst_32 {dimension_numbers = #tpu.dot_dimension_numbers<[1], [0], [0], [1], [0, 0, 1, 1], [], []>} : vector<1x128xbf16>, vector<128x128xbf16>, vector<1x128xf32> -> vector<1x128xf32>
    %c2 = arith.constant 2 : index
    %c0_33 = arith.constant 0 : index
    %62 = vector.load %arg3[%c2, %c0_33] : memref<8x128xf32, #tpu.memory_space<vmem>>, vector<1x128xf32>
    %63 = arith.addf %61, %62 : vector<1x128xf32>
    %64 = arith.mulf %54, %5 : vector<1x128xf32>
    %65 = arith.addf %64, %7 : vector<1x128xf32>
    %66 = arith.mulf %6, %63 : vector<1x128xf32>
    %67 = arith.addf %65, %66 : vector<1x128xf32>
    %cst_34 = arith.constant 3.000000e+01 : f32
    %68 = vector.broadcast %cst_34 : f32 to vector<1x128xf32>
    %69 = arith.cmpf oge, %67, %68 : vector<1x128xf32>
    %cst_35 = arith.constant 3.000000e+01 : f32
    %70 = vector.broadcast %cst_35 : f32 to vector<1x128xf32>
    %71 = arith.subf %67, %70 : vector<1x128xf32>
    %72 = arith.negf %71 : vector<1x128xf32>
    %73 = math.exp %72 : vector<1x128xf32>
    %cst_36 = arith.constant 1.000000e+00 : f32
    %74 = vector.broadcast %cst_36 : f32 to vector<1x128xf32>
    %75 = arith.addf %74, %73 : vector<1x128xf32>
    %76 = arith.divf %74, %75 : vector<1x128xf32>
    %c2_37 = arith.constant 2 : index
    %c0_38 = arith.constant 0 : index
    %77 = vector.load %arg5[%c2_37, %c0_38] : memref<8x128xf32, #tpu.memory_space<vmem>>, vector<1x128xf32>
    tpu.vector_store %arg5[%c2_37, %c0_38], %76 {strides = array<i32>} : memref<8x128xf32, #tpu.memory_space<vmem>>, vector<1x128xf32>,
    %78 = arith.select %69, %4, %67 : vector<1x128xi1>, vector<1x128xf32>
    %79 = arith.mulf %57, %8 : vector<1x128xf32>
    %cst_39 = arith.constant 1.000000e+00 : f32
    %80 = vector.broadcast %cst_39 : f32 to vector<1x128xf32>
    %81 = arith.select %69, %80, %79 : vector<1x128xi1>, vector<1x128xf32>
    %c2_40 = arith.constant 2 : index
    %c0_41 = arith.constant 0 : index
    %82 = vector.load %arg4[%c2_40, %c0_41] : memref<8x128xf32, #tpu.memory_space<vmem>>, vector<1x128xf32>
    tpu.vector_store %arg4[%c2_40, %c0_41], %78 {strides = array<i32>} : memref<8x128xf32, #tpu.memory_space<vmem>>, vector<1x128xf32>,
    %83 = arith.truncf %81 : vector<1x128xf32> to vector<1x128xbf16>
    %c0_42 = arith.constant 0 : index
    %c0_43 = arith.constant 0 : index
    %84 = vector.load %arg7[%c0_42, %c0_43] : memref<128x128xbf16, #tpu.memory_space<vmem>>, vector<128x128xbf16>
    %cst_44 = arith.constant dense<0.000000e+00> : vector<1x128xf32>
    %85 = tpu.matmul %83, %84, %cst_44 {dimension_numbers = #tpu.dot_dimension_numbers<[1], [0], [0], [1], [0, 0, 1, 1], [], []>} : vector<1x128xbf16>, vector<128x128xbf16>, vector<1x128xf32> -> vector<1x128xf32>
    %c3 = arith.constant 3 : index
    %c0_45 = arith.constant 0 : index
    %86 = vector.load %arg3[%c3, %c0_45] : memref<8x128xf32, #tpu.memory_space<vmem>>, vector<1x128xf32>
    %87 = arith.addf %85, %86 : vector<1x128xf32>
    %88 = arith.mulf %78, %5 : vector<1x128xf32>
    %89 = arith.addf %88, %7 : vector<1x128xf32>
    %90 = arith.mulf %6, %87 : vector<1x128xf32>
    %91 = arith.addf %89, %90 : vector<1x128xf32>
    %cst_46 = arith.constant 3.000000e+01 : f32
    %92 = vector.broadcast %cst_46 : f32 to vector<1x128xf32>
    %93 = arith.cmpf oge, %91, %92 : vector<1x128xf32>
    %cst_47 = arith.constant 3.000000e+01 : f32
    %94 = vector.broadcast %cst_47 : f32 to vector<1x128xf32>
    %95 = arith.subf %91, %94 : vector<1x128xf32>
    %96 = arith.negf %95 : vector<1x128xf32>
    %97 = math.exp %96 : vector<1x128xf32>
    %cst_48 = arith.constant 1.000000e+00 : f32
    %98 = vector.broadcast %cst_48 : f32 to vector<1x128xf32>
    %99 = arith.addf %98, %97 : vector<1x128xf32>
    %100 = arith.divf %98, %99 : vector<1x128xf32>
    %c3_49 = arith.constant 3 : index
    %c0_50 = arith.constant 0 : index
    %101 = vector.load %arg5[%c3_49, %c0_50] : memref<8x128xf32, #tpu.memory_space<vmem>>, vector<1x128xf32>
    tpu.vector_store %arg5[%c3_49, %c0_50], %100 {strides = array<i32>} : memref<8x128xf32, #tpu.memory_space<vmem>>, vector<1x128xf32>,
    %102 = arith.select %93, %4, %91 : vector<1x128xi1>, vector<1x128xf32>
    %103 = arith.mulf %81, %8 : vector<1x128xf32>
    %cst_51 = arith.constant 1.000000e+00 : f32
    %104 = vector.broadcast %cst_51 : f32 to vector<1x128xf32>
    %105 = arith.select %93, %104, %103 : vector<1x128xi1>, vector<1x128xf32>
    %c3_52 = arith.constant 3 : index
    %c0_53 = arith.constant 0 : index
    %106 = vector.load %arg4[%c3_52, %c0_53] : memref<8x128xf32, #tpu.memory_space<vmem>>, vector<1x128xf32>
    tpu.vector_store %arg4[%c3_52, %c0_53], %102 {strides = array<i32>} : memref<8x128xf32, #tpu.memory_space<vmem>>, vector<1x128xf32>,
    %107 = arith.truncf %105 : vector<1x128xf32> to vector<1x128xbf16>
    %c0_54 = arith.constant 0 : index
    %c0_55 = arith.constant 0 : index
    %108 = vector.load %arg7[%c0_54, %c0_55] : memref<128x128xbf16, #tpu.memory_space<vmem>>, vector<128x128xbf16>
    %cst_56 = arith.constant dense<0.000000e+00> : vector<1x128xf32>
    %109 = tpu.matmul %107, %108, %cst_56 {dimension_numbers = #tpu.dot_dimension_numbers<[1], [0], [0], [1], [0, 0, 1, 1], [], []>} : vector<1x128xbf16>, vector<128x128xbf16>, vector<1x128xf32> -> vector<1x128xf32>
    %c4 = arith.constant 4 : index
    %c0_57 = arith.constant 0 : index
    %110 = vector.load %arg3[%c4, %c0_57] : memref<8x128xf32, #tpu.memory_space<vmem>>, vector<1x128xf32>
    %111 = arith.addf %109, %110 : vector<1x128xf32>
    %112 = arith.mulf %102, %5 : vector<1x128xf32>
    %113 = arith.addf %112, %7 : vector<1x128xf32>
    %114 = arith.mulf %6, %111 : vector<1x128xf32>
    %115 = arith.addf %113, %114 : vector<1x128xf32>
    %cst_58 = arith.constant 3.000000e+01 : f32
    %116 = vector.broadcast %cst_58 : f32 to vector<1x128xf32>
    %117 = arith.cmpf oge, %115, %116 : vector<1x128xf32>
    %cst_59 = arith.constant 3.000000e+01 : f32
    %118 = vector.broadcast %cst_59 : f32 to vector<1x128xf32>
    %119 = arith.subf %115, %118 : vector<1x128xf32>
    %120 = arith.negf %119 : vector<1x128xf32>
    %121 = math.exp %120 : vector<1x128xf32>
    %cst_60 = arith.constant 1.000000e+00 : f32
    %122 = vector.broadcast %cst_60 : f32 to vector<1x128xf32>
    %123 = arith.addf %122, %121 : vector<1x128xf32>
    %124 = arith.divf %122, %123 : vector<1x128xf32>
    %c4_61 = arith.constant 4 : index
    %c0_62 = arith.constant 0 : index
    %125 = vector.load %arg5[%c4_61, %c0_62] : memref<8x128xf32, #tpu.memory_space<vmem>>, vector<1x128xf32>
    tpu.vector_store %arg5[%c4_61, %c0_62], %124 {strides = array<i32>} : memref<8x128xf32, #tpu.memory_space<vmem>>, vector<1x128xf32>,
    %126 = arith.select %117, %4, %115 : vector<1x128xi1>, vector<1x128xf32>
    %127 = arith.mulf %105, %8 : vector<1x128xf32>
    %cst_63 = arith.constant 1.000000e+00 : f32
    %128 = vector.broadcast %cst_63 : f32 to vector<1x128xf32>
    %129 = arith.select %117, %128, %127 : vector<1x128xi1>, vector<1x128xf32>
    %c4_64 = arith.constant 4 : index
    %c0_65 = arith.constant 0 : index
    %130 = vector.load %arg4[%c4_64, %c0_65] : memref<8x128xf32, #tpu.memory_space<vmem>>, vector<1x128xf32>
    tpu.vector_store %arg4[%c4_64, %c0_65], %126 {strides = array<i32>} : memref<8x128xf32, #tpu.memory_space<vmem>>, vector<1x128xf32>,
    %131 = arith.truncf %129 : vector<1x128xf32> to vector<1x128xbf16>
    %c0_66 = arith.constant 0 : index
    %c0_67 = arith.constant 0 : index
    %132 = vector.load %arg7[%c0_66, %c0_67] : memref<128x128xbf16, #tpu.memory_space<vmem>>, vector<128x128xbf16>
    %cst_68 = arith.constant dense<0.000000e+00> : vector<1x128xf32>
    %133 = tpu.matmul %131, %132, %cst_68 {dimension_numbers = #tpu.dot_dimension_numbers<[1], [0], [0], [1], [0, 0, 1, 1], [], []>} : vector<1x128xbf16>, vector<128x128xbf16>, vector<1x128xf32> -> vector<1x128xf32>
    %c5 = arith.constant 5 : index
    %c0_69 = arith.constant 0 : index
    %134 = vector.load %arg3[%c5, %c0_69] : memref<8x128xf32, #tpu.memory_space<vmem>>, vector<1x128xf32>
    %135 = arith.addf %133, %134 : vector<1x128xf32>
    %136 = arith.mulf %126, %5 : vector<1x128xf32>
    %137 = arith.addf %136, %7 : vector<1x128xf32>
    %138 = arith.mulf %6, %135 : vector<1x128xf32>
    %139 = arith.addf %137, %138 : vector<1x128xf32>
    %cst_70 = arith.constant 3.000000e+01 : f32
    %140 = vector.broadcast %cst_70 : f32 to vector<1x128xf32>
    %141 = arith.cmpf oge, %139, %140 : vector<1x128xf32>
    %cst_71 = arith.constant 3.000000e+01 : f32
    %142 = vector.broadcast %cst_71 : f32 to vector<1x128xf32>
    %143 = arith.subf %139, %142 : vector<1x128xf32>
    %144 = arith.negf %143 : vector<1x128xf32>
    %145 = math.exp %144 : vector<1x128xf32>
    %cst_72 = arith.constant 1.000000e+00 : f32
    %146 = vector.broadcast %cst_72 : f32 to vector<1x128xf32>
    %147 = arith.addf %146, %145 : vector<1x128xf32>
    %148 = arith.divf %146, %147 : vector<1x128xf32>
    %c5_73 = arith.constant 5 : index
    %c0_74 = arith.constant 0 : index
    %149 = vector.load %arg5[%c5_73, %c0_74] : memref<8x128xf32, #tpu.memory_space<vmem>>, vector<1x128xf32>
    tpu.vector_store %arg5[%c5_73, %c0_74], %148 {strides = array<i32>} : memref<8x128xf32, #tpu.memory_space<vmem>>, vector<1x128xf32>,
    %150 = arith.select %141, %4, %139 : vector<1x128xi1>, vector<1x128xf32>
    %151 = arith.mulf %129, %8 : vector<1x128xf32>
    %cst_75 = arith.constant 1.000000e+00 : f32
    %152 = vector.broadcast %cst_75 : f32 to vector<1x128xf32>
    %153 = arith.select %141, %152, %151 : vector<1x128xi1>, vector<1x128xf32>
    %c5_76 = arith.constant 5 : index
    %c0_77 = arith.constant 0 : index
    %154 = vector.load %arg4[%c5_76, %c0_77] : memref<8x128xf32, #tpu.memory_space<vmem>>, vector<1x128xf32>
    tpu.vector_store %arg4[%c5_76, %c0_77], %150 {strides = array<i32>} : memref<8x128xf32, #tpu.memory_space<vmem>>, vector<1x128xf32>,
    %155 = arith.truncf %153 : vector<1x128xf32> to vector<1x128xbf16>
    %c0_78 = arith.constant 0 : index
    %c0_79 = arith.constant 0 : index
    %156 = vector.load %arg7[%c0_78, %c0_79] : memref<128x128xbf16, #tpu.memory_space<vmem>>, vector<128x128xbf16>
    %cst_80 = arith.constant dense<0.000000e+00> : vector<1x128xf32>
    %157 = tpu.matmul %155, %156, %cst_80 {dimension_numbers = #tpu.dot_dimension_numbers<[1], [0], [0], [1], [0, 0, 1, 1], [], []>} : vector<1x128xbf16>, vector<128x128xbf16>, vector<1x128xf32> -> vector<1x128xf32>
    %c6 = arith.constant 6 : index
    %c0_81 = arith.constant 0 : index
    %158 = vector.load %arg3[%c6, %c0_81] : memref<8x128xf32, #tpu.memory_space<vmem>>, vector<1x128xf32>
    %159 = arith.addf %157, %158 : vector<1x128xf32>
    %160 = arith.mulf %150, %5 : vector<1x128xf32>
    %161 = arith.addf %160, %7 : vector<1x128xf32>
    %162 = arith.mulf %6, %159 : vector<1x128xf32>
    %163 = arith.addf %161, %162 : vector<1x128xf32>
    %cst_82 = arith.constant 3.000000e+01 : f32
    %164 = vector.broadcast %cst_82 : f32 to vector<1x128xf32>
    %165 = arith.cmpf oge, %163, %164 : vector<1x128xf32>
    %cst_83 = arith.constant 3.000000e+01 : f32
    %166 = vector.broadcast %cst_83 : f32 to vector<1x128xf32>
    %167 = arith.subf %163, %166 : vector<1x128xf32>
    %168 = arith.negf %167 : vector<1x128xf32>
    %169 = math.exp %168 : vector<1x128xf32>
    %cst_84 = arith.constant 1.000000e+00 : f32
    %170 = vector.broadcast %cst_84 : f32 to vector<1x128xf32>
    %171 = arith.addf %170, %169 : vector<1x128xf32>
    %172 = arith.divf %170, %171 : vector<1x128xf32>
    %c6_85 = arith.constant 6 : index
    %c0_86 = arith.constant 0 : index
    %173 = vector.load %arg5[%c6_85, %c0_86] : memref<8x128xf32, #tpu.memory_space<vmem>>, vector<1x128xf32>
    tpu.vector_store %arg5[%c6_85, %c0_86], %172 {strides = array<i32>} : memref<8x128xf32, #tpu.memory_space<vmem>>, vector<1x128xf32>,
    %174 = arith.select %165, %4, %163 : vector<1x128xi1>, vector<1x128xf32>
    %175 = arith.mulf %153, %8 : vector<1x128xf32>
    %cst_87 = arith.constant 1.000000e+00 : f32
    %176 = vector.broadcast %cst_87 : f32 to vector<1x128xf32>
    %177 = arith.select %165, %176, %175 : vector<1x128xi1>, vector<1x128xf32>
    %c6_88 = arith.constant 6 : index
    %c0_89 = arith.constant 0 : index
    %178 = vector.load %arg4[%c6_88, %c0_89] : memref<8x128xf32, #tpu.memory_space<vmem>>, vector<1x128xf32>
    tpu.vector_store %arg4[%c6_88, %c0_89], %174 {strides = array<i32>} : memref<8x128xf32, #tpu.memory_space<vmem>>, vector<1x128xf32>,
    %179 = arith.truncf %177 : vector<1x128xf32> to vector<1x128xbf16>
    %c0_90 = arith.constant 0 : index
    %c0_91 = arith.constant 0 : index
    %180 = vector.load %arg7[%c0_90, %c0_91] : memref<128x128xbf16, #tpu.memory_space<vmem>>, vector<128x128xbf16>
    %cst_92 = arith.constant dense<0.000000e+00> : vector<1x128xf32>
    %181 = tpu.matmul %179, %180, %cst_92 {dimension_numbers = #tpu.dot_dimension_numbers<[1], [0], [0], [1], [0, 0, 1, 1], [], []>} : vector<1x128xbf16>, vector<128x128xbf16>, vector<1x128xf32> -> vector<1x128xf32>
    %c7 = arith.constant 7 : index
    %c0_93 = arith.constant 0 : index
    %182 = vector.load %arg3[%c7, %c0_93] : memref<8x128xf32, #tpu.memory_space<vmem>>, vector<1x128xf32>
    %183 = arith.addf %181, %182 : vector<1x128xf32>
    %184 = arith.mulf %174, %5 : vector<1x128xf32>
    %185 = arith.addf %184, %7 : vector<1x128xf32>
    %186 = arith.mulf %6, %183 : vector<1x128xf32>
    %187 = arith.addf %185, %186 : vector<1x128xf32>
    %cst_94 = arith.constant 3.000000e+01 : f32
    %188 = vector.broadcast %cst_94 : f32 to vector<1x128xf32>
    %189 = arith.cmpf oge, %187, %188 : vector<1x128xf32>
    %cst_95 = arith.constant 3.000000e+01 : f32
    %190 = vector.broadcast %cst_95 : f32 to vector<1x128xf32>
    %191 = arith.subf %187, %190 : vector<1x128xf32>
    %192 = arith.negf %191 : vector<1x128xf32>
    %193 = math.exp %192 : vector<1x128xf32>
    %cst_96 = arith.constant 1.000000e+00 : f32
    %194 = vector.broadcast %cst_96 : f32 to vector<1x128xf32>
    %195 = arith.addf %194, %193 : vector<1x128xf32>
    %196 = arith.divf %194, %195 : vector<1x128xf32>
    %c7_97 = arith.constant 7 : index
    %c0_98 = arith.constant 0 : index
    %197 = vector.load %arg5[%c7_97, %c0_98] : memref<8x128xf32, #tpu.memory_space<vmem>>, vector<1x128xf32>
    tpu.vector_store %arg5[%c7_97, %c0_98], %196 {strides = array<i32>} : memref<8x128xf32, #tpu.memory_space<vmem>>, vector<1x128xf32>,
    %198 = arith.select %189, %4, %187 : vector<1x128xi1>, vector<1x128xf32>
    %199 = arith.mulf %177, %8 : vector<1x128xf32>
    %cst_99 = arith.constant 1.000000e+00 : f32
    %200 = vector.broadcast %cst_99 : f32 to vector<1x128xf32>
    %201 = arith.select %189, %200, %199 : vector<1x128xi1>, vector<1x128xf32>
    %c7_100 = arith.constant 7 : index
    %c0_101 = arith.constant 0 : index
    %202 = vector.load %arg4[%c7_100, %c0_101] : memref<8x128xf32, #tpu.memory_space<vmem>>, vector<1x128xf32>
    tpu.vector_store %arg4[%c7_100, %c0_101], %198 {strides = array<i32>} : memref<8x128xf32, #tpu.memory_space<vmem>>, vector<1x128xf32>,
    %c0_102 = arith.constant 0 : index
    %c0_103 = arith.constant 0 : index
    %203 = vector.load %arg9[%c0_102, %c0_103] : memref<1x128xf32, #tpu.memory_space<vmem>>, vector<1x128xf32>
    tpu.vector_store %arg9[%c0_102, %c0_103], %198 {strides = array<i32>} : memref<1x128xf32, #tpu.memory_space<vmem>>, vector<1x128xf32>,
    %c0_104 = arith.constant 0 : index
    %c0_105 = arith.constant 0 : index
    %204 = vector.load %arg10[%c0_104, %c0_105] : memref<1x128xf32, #tpu.memory_space<vmem>>, vector<1x128xf32>
    tpu.vector_store %arg10[%c0_104, %c0_105], %201 {strides = array<i32>} : memref<1x128xf32, #tpu.memory_space<vmem>>, vector<1x128xf32>,
    %c0_i32_106 = arith.constant 0 : i32
    %205 = arith.cmpi eq, %arg0, %c0_i32_106 : i32
    %206 = arith.extui %205 : i1 to i32
    %c0_i32_107 = arith.constant 0 : i32
    %207 = arith.cmpi ne, %206, %c0_i32_107 : i32
    scf.if %207 {
      %c0_108 = arith.constant 0 : index
      %c0_109 = arith.constant 0 : index
      %208 = vector.load %arg6[%c0_108, %c0_109] : memref<1x128xf32, #tpu.memory_space<vmem>>, vector<1x128xf32>
      tpu.vector_store %arg6[%c0_108, %c0_109], %201 {strides = array<i32>} : memref<1x128xf32, #tpu.memory_space<vmem>>, vector<1x128xf32>,
    } else {
    }
    return
  }
  func.func @transform_1(%arg0: i32) -> (i32, i32) {
    %c0_i32 = arith.constant 0 : i32
    %c0_i32_0 = arith.constant 0 : i32
    %c0_i32_1 = arith.constant 0 : i32
    return %c0_i32, %c0_i32_0 : i32, i32
  }
  func.func @transform_2(%arg0: i32) -> (i32, i32) {
    %c0_i32 = arith.constant 0 : i32
    %c0_i32_0 = arith.constant 0 : i32
    return %arg0, %c0_i32 : i32, i32
  }
  func.func @transform_3(%arg0: i32) -> (i32, i32) {
    %c0_i32 = arith.constant 0 : i32
    %c0_i32_0 = arith.constant 0 : i32
    return %arg0, %c0_i32 : i32, i32
  }
  func.func @transform_4(%arg0: i32) -> (i32, i32) {
    %c0_i32 = arith.constant 0 : i32
    %c0_i32_0 = arith.constant 0 : i32
    return %arg0, %c0_i32 : i32, i32
  }
  func.func @transform_5(%arg0: i32) -> (i32, i32) {
    %c0_i32 = arith.constant 0 : i32
    %c0_i32_0 = arith.constant 0 : i32
    %c0_i32_1 = arith.constant 0 : i32
    return %c0_i32, %c0_i32_0 : i32, i32
  }
}

</mosaic_0001>

<bundles_post_ra>
// kernel: lif_rollout.1
= control target key start
LH: loop header
LB: loop body
LE: loop exit
PB: predicated region body
PF: predicated region fallthrough
CT: control target
= control target key end

     0   :  { %11 = vsyncpa [#allocation7], 0  ;;  %s1715_s0 = inlined_call_operand.vmem [shape: bf16[128,128], index: 0, kind: input, shape index: {}]   ;;  %s1716_s1 = inlined_call_operand.vmem [shape: f32[8,128], index: 1, kind: input, shape index: {}]   ;;  %s1717_s2 = inlined_call_operand.vmem [shape: f32[8,128], index: 2, kind: input, shape index: {}]   ;;  %s1718_s3 = inlined_call_operand.vmem [shape: f32[8,128], index: 3, kind: output, shape index: {0}]   ;;  %s1719_s4 = inlined_call_operand.vmem [shape: f32[8,128], index: 4, kind: output, shape index: {1}]   ;;  %s1720_s5 = inlined_call_operand.hbm [shape: f32[1,128], index: 5, kind: output, shape index: {2}]  }
   0x1   :  { %v30_v0 = vld [vmem:[%s1715_s0] sm:$0xff]  ;;  %v32_v1 = vld [vmem:[%s1715_s0 + $0x8] sm:$0xff]  ;;  %v34_v2 = vld [vmem:[%s1715_s0 + $0x10] sm:$0xff] }
   0x2   :  { %31 = vst [vmem:[#allocation2 + $0x30] sm:$0xff] %v30_v0  ;;  %v36_v3 = vld [vmem:[%s1715_s0 + $0x18] sm:$0xff]  ;;  %v38_v4 = vld [vmem:[%s1715_s0 + $0x20] sm:$0xff]  ;;  %v40_v5 = vld [vmem:[%s1715_s0 + $0x28] sm:$0xff] }
   0x3   :  { %33 = vst [vmem:[#allocation2] sm:$0xff] %v32_v1  ;;  %v42_v6 = vld [vmem:[%s1715_s0 + $0x30] sm:$0xff]  ;;  %v44_v7 = vld [vmem:[%s1715_s0 + $0x38] sm:$0xff] }
   0x4   :  { %35 = vst [vmem:[#allocation2 + $0x18] sm:$0xff] %v34_v2 }
   0x5   :  { %37 = vst [vmem:[#allocation2 + $0x10] sm:$0xff] %v36_v3 }
   0x6   :  { %39 = vst [vmem:[#allocation2 + $0x8] sm:$0xff] %v38_v4 }
   0x7   :  { %41 = vst [vmem:[#allocation2 + $0x20] sm:$0xff] %v40_v5 }
   0x8   :  { %43 = vst [vmem:[#allocation2 + $0x28] sm:$0xff] %v42_v6 }
   0x9   :  { %45 = vst [vmem:[#allocation2 + $0x38] sm:$0xff] %v44_v7 }
   0xa   :  { %51 = vsyncadd [#allocation3], 1024 }
   0xb   :  { %1530 = dma.done.wait [#allocation3], 1024 }
   0xc   :  { %1531 = vsyncadd [#allocation3], 4294966272  ;;  %v58_v10 = vld [vmem:[%s1716_s1 + $0x6] sm:$0x1]  ;;  %v1412_v15 = vld [vmem:[#allocation2 + $0x10] sm:$0xff]  ;;  %s1534_s6 = smov [#allocation6]  }
   0xd   :  { %59 = vst [vmem:[#allocation5] sm:$0x1] %v58_v10  ;;  %v1595_v12 = vld [vmem:[%s1716_s1] sm:$0xff]  ;;  %v1413_v14 = vld [vmem:[#allocation2 + $0x8] sm:$0xff]  ;;  %v1410_v17 = vld [vmem:[#allocation2] sm:$0xff]  ;;  %s1111_s7 = sshll.u32 %s1534_s6, 4  ;;  %s1112_s7 = int_to_ptr.vmem [resolvable:$true] %s1111_s7 }
   0xe   :  { %143 = vst [vmem:[#allocation1] sm:$0xff] %v1595_v12  ;;  %v1414_v13 = vld [vmem:[#allocation2 + $0x20] sm:$0xff]  ;;  %v1411_v16 = vld [vmem:[#allocation2 + $0x18] sm:$0xff]  ;;  %v1409_v18 = vld [vmem:[#allocation2 + $0x30] sm:$0xff]  ;;  %s1113_s10 = sshll.u32 %s1720_s5, 4  ;;  %s1114_s10 = int_to_ptr.hbm [resolvable:$true] %s1113_s10 }
   0xf   :  { %v1415_v9 = vld [vmem:[#allocation2 + $0x28] sm:$0xff]  ;;  %v56_v23 = vld [vmem:[%s1716_s1 + $0x5] sm:$0x1]  ;;  %v1422_v24 = vld [vmem:[#allocation2 + $0x20] sm:$0xff] }
  0x10   :  { %v1416_v8 = vld [vmem:[#allocation2 + $0x38] sm:$0xff]  ;;  %v1423_v22 = vld [vmem:[#allocation2 + $0x28] sm:$0xff]  ;;  %57 = vst [vmem:[#allocation4] sm:$0x1] %v56_v23  ;;  %v1420_v26 = vld [vmem:[#allocation2 + $0x10] sm:$0xff] }
  0x11   :  { %129 = vmatpush.bf16.msra.mxu0 %v1416_v8  ;;  %v1424_v11 = vld [vmem:[#allocation2 + $0x38] sm:$0xff]  ;;  %v1421_v25 = vld [vmem:[#allocation2 + $0x8] sm:$0xff]  ;;  %v1418_v28 = vld [vmem:[#allocation2] sm:$0xff] }
  0x12   :  { %259 = vmatpush.bf16.msra.mxu1 %v1424_v11  ;;  %v1419_v27 = vld [vmem:[#allocation2 + $0x18] sm:$0xff]  ;;  %v1417_v29 = vld [vmem:[#allocation2 + $0x30] sm:$0xff]  ;;  %v1431_v63 = vld [vmem:[#allocation2 + $0x28] sm:$0xff] }
  0x13   :  { %v80_v30 = vld [vmem:[%s1717_s2] sm:$0x1]  ;;  %v1430_v0 = vld [vmem:[#allocation2 + $0x20] sm:$0xff]  ;;  %v1429_v1 = vld [vmem:[#allocation2 + $0x8] sm:$0xff] }
  0x14   :  { %v62_v19 = vld [vmem:[#allocation5] sm:$0x1]  ;;  %v1432_v42 = vld [vmem:[#allocation2 + $0x38] sm:$0xff]  ;;  %v1428_v2 = vld [vmem:[#allocation2 + $0x10] sm:$0xff] }
  0x15   :  { %130 = vmatpush.bf16.msra.mxu0 %v1415_v9  ;;  %v63_v20 = vpack.c.bf16 %v62_v19, %v62_v19  ;;  %v145_v21 = vld [vmem:[#allocation1 + $0x1] ss:$9 sm:$0xff]  ;;  %388 = vmatpush.bf16.msra.mxu2 %v1432_v42 }
  0x16   :  { %148 = vst [vmem:[#allocation1] sm:$0xff] %v1595_v12  ;;  %260 = vmatpush.bf16.msra.mxu1 %v1423_v22  ;;  %v1427_v3 = vld [vmem:[#allocation2 + $0x18] sm:$0xff]  ;;  %v1426_v4 = vld [vmem:[#allocation2] sm:$0xff]  ;;  %v1425_v5 = vld [vmem:[#allocation2 + $0x30] sm:$0xff] }
  0x17   :  { %v61_v35 = vld [vmem:[#allocation4] sm:$0x1]  ;;  %v210_v6 = vld [vmem:[%s1717_s2 + $0x1] sm:$0x1]  ;;  %v1436_v42 = vld [vmem:[#allocation2 + $0x10] sm:$0xff] }
  0x18   :  { %v147_v37 = vmul.f32 %v145_v21, %v61_v35 }
  0x19   :  { %131 = vmatpush.bf16.msra.mxu0 %v1414_v13  ;;  %389 = vmatpush.bf16.msra.mxu2 %v1431_v63 }
  0x1a   :  { %261 = vmatpush.bf16.msra.mxu1 %v1422_v24 }
  0x1d   :  { %132 = vmatpush.bf16.msra.mxu0 %v1413_v14  ;;  %v150_v34 = vld [vmem:[#allocation1 + $0x3] ss:$9 sm:$0xff]  ;;  %390 = vmatpush.bf16.msra.mxu2 %v1430_v0 }
  0x1e   :  { %262 = vmatpush.bf16.msra.mxu1 %v1421_v25  ;;  %v152_v39 = vadd.f32 %v150_v34, %v147_v37 }
  0x21   :  { %133 = vmatpush.bf16.msra.mxu0 %v1412_v15  ;;  %391 = vmatpush.bf16.msra.mxu2 %v1429_v1 }
  0x22   :  { %263 = vmatpush.bf16.msra.mxu1 %v1420_v26 }
  0x25   :  { %134 = vmatpush.bf16.msra.mxu0 %v1411_v16  ;;  %392 = vmatpush.bf16.msra.mxu2 %v1428_v2 }
  0x26   :  { %264 = vmatpush.bf16.msra.mxu1 %v1419_v27 }
  0x29   :  { %135 = vmatpush.bf16.msra.mxu0 %v1410_v17  ;;  %393 = vmatpush.bf16.msra.mxu2 %v1427_v3 }
  0x2a   :  { %265 = vmatpush.bf16.msra.mxu1 %v1418_v28 }
  0x2d   :  { %136 = vmatpush.bf16.msra.mxu0 %v1409_v18  ;;  %394 = vmatpush.bf16.msra.mxu2 %v1426_v4  ;;  %v1440_v18 = vld [vmem:[#allocation2 + $0x38] sm:$0xff] }
  0x2e   :  { %266 = vmatpush.bf16.msra.mxu1 %v1417_v29  ;;  %517 = vmatpush.bf16.msra.mxu3 %v1440_v18  ;;  %v1444_v18 = vld [vmem:[#allocation2 + $0x10] sm:$0xff] }
  0x30   :  { %137 = vmatmul.bf16.vlgmr.msra.gmra.mxu0 %v63_v20 }
  0x31   :  { %395 = vmatpush.bf16.msra.mxu2 %v1425_v5 }
  0xad   :  { %v138_v31 = vpop.f32.mrf.mxu0 }
  0xae   :  { %v139_v32 = vadd.f32 %v138_v31, %v80_v30 }
  0xb0   :  { %v154_v33 = vrot.slane %v139_v32, 6 }
  0xb2   :  { %v156_v36 = vmul.f32 %v154_v33, %v1595_v12 }
  0xb4   :  { %158 = vst [vmem:[#allocation1] sm:$0xff] %v156_v36 }
  0xb5   :  { %v140_v38 = vpop.f32.mrf.mxu0 }
  0xbb   :  { %v160_v40 = vld [vmem:[#allocation1 + $0x2] ss:$9 sm:$0xff] }
  0xbc   :  { %186 = vst [vmem:[#allocation1] sm:$0xff] %v1595_v12  ;;  %v162_v41 = vadd.f32 %v160_v40, %v152_v39  ;;  %v1439_v39 = vld [vmem:[#allocation2 + $0x28] sm:$0xff]  ;;  %v1438_v40 = vld [vmem:[#allocation2 + $0x20] sm:$0xff] }
  0xbd   :  { %518 = vmatpush.bf16.msra.mxu3 %v1439_v39 }
  0xbe   :  { %vm163_vm0 = vcmp.ge.f32.partialorder %v162_v41, 30.0  ;;  %v1168_v43 = vadd.f32 -30.0, %v162_v41 }
  0xbf   :  { %v185_v44 = vsel %vm163_vm0, %v1595_v12, %v162_v41  ;;  %v1437_v41 = vld [vmem:[#allocation2 + $0x8] sm:$0xff] }
  0xc0   :  { %v1169_v45 = vmul.f32 -1.442695, %v1168_v43  ;;  %192 = vst [vmem:[%s1718_s3] sm:$0x1] %v185_v44  ;;  %v1435_v43 = vld [vmem:[#allocation2 + $0x18] sm:$0xff] }
  0xc1   :  { %519 = vmatpush.bf16.msra.mxu3 %v1438_v40 }
  0xc2   :  { %1474 = vpow2.f32 %v1169_v45  ;;  %v1433_v45 = vld [vmem:[#allocation2 + $0x30] sm:$0xff] }
  0xc3   :  { %v188_v46 = vld [vmem:[#allocation1 + $0x4] ss:$9 sm:$0xff] }
  0xc4   :  { %272 = vst [vmem:[#allocation1] sm:$0xff] %v1595_v12  ;;  %v190_v47 = vmul.f32 %v188_v46, %v62_v19  ;;  %v339_v46 = vld [vmem:[%s1717_s2 + $0x2] sm:$0x1] }
  0xc5   :  { %520 = vmatpush.bf16.msra.mxu3 %v1437_v41 }
  0xc6   :  { %v191_v48 = vsel %vm163_vm0, 1.0, %v190_v47 }
  0xc7   :  { %v193_v49 = vpack.c.bf16 %v191_v48, %v191_v48 }
  0xc8   :  { %v1475_v50 = vpop.eup %1474 }
  0xc9   :  { %v168_v51 = vadd.f32 1.0, %v1475_v50  ;;  %267 = vmatmul.bf16.vlgmr.msra.gmra.mxu1 %v193_v49  ;;  %521 = vmatpush.bf16.msra.mxu3 %v1436_v42 }
  0xcb   :  { %v274_v52 = vld [vmem:[#allocation1 + $0x1] ss:$9 sm:$0xff]  ;;  %1476 = vrcp.f32 %v168_v51  ;;  %v180_v56 = vand.u32 2147483648, %v168_v51  ;;  %v178_v58 = vand.u32 2147483647, %v168_v51  ;;  %vm174_vm2 = vweird.f32 %v168_v51 }
  0xcc   :  { %277 = vst [vmem:[#allocation1] sm:$0xff] %v1595_v12  ;;  %v276_v14 = vmul.f32 %v274_v52, %v185_v44  ;;  %v1434_v44 = vld [vmem:[#allocation2] sm:$0xff] }
  0xcd   :  { %v181_v60 = vor.u32 1.1754944e-38, %v180_v56  ;;  %vm179_vm4 = vcmp.eq.f32.partialorder %v178_v58, 8.507059e+37  ;;  %522 = vmatpush.bf16.msra.mxu3 %v1435_v43 }
  0xd1   :  { %v1477_v53 = vpop.eup %1476  ;;  %523 = vmatpush.bf16.msra.mxu3 %v1434_v44 }
  0xd2   :  { %v170_v54 = vmul.f32 %v1477_v53, %v168_v51  ;;  %vm175_vm1 = vweird.f32 %v1477_v53 }
  0xd3   :  { %vm176_vm3 = vmor %vm174_vm2, %vm175_vm1  ;;  %v279_v11 = vld [vmem:[#allocation1 + $0x3] ss:$9 sm:$0xff] }
  0xd4   :  { %v171_v55 = vsub.f32 1.0, %v170_v54  ;;  %v281_v15 = vadd.f32 %v279_v11, %v276_v14 }
  0xd5   :  { %524 = vmatpush.bf16.msra.mxu3 %v1433_v45 }
  0xd6   :  { %v172_v57 = vmul.f32 %v1477_v53, %v171_v55 }
  0xd8   :  { %v173_v59 = vadd.f32 %v1477_v53, %v172_v57  ;;  %v1448_v57 = vld [vmem:[#allocation2 + $0x38] sm:$0xff] }
  0xd9   :  { %646 = vmatpush.bf16.msrb.mxu0 %v1448_v57  ;;  %v1452_v57 = vld [vmem:[#allocation2 + $0x10] sm:$0xff] }
  0xda   :  { %v177_v61 = vsel %vm176_vm3, %v1477_v53, %v173_v59 }
  0xdb   :  { %v182_v62 = vsel %vm179_vm4, %v181_v60, %v177_v61 }
  0xdc   :  { %184 = vst [vmem:[%s1719_s4] sm:$0x1] %v182_v62 }
 0x146   :  { %v268_v7 = vpop.f32.mrf.mxu1 }
 0x147   :  { %v269_v8 = vadd.f32 %v268_v7, %v210_v6 }
 0x149   :  { %v283_v9 = vrot.slane %v269_v8, 6 }
 0x14b   :  { %v285_v10 = vmul.f32 %v283_v9, %v1595_v12 }
 0x14d   :  { %287 = vst [vmem:[#allocation1] sm:$0xff] %v285_v10 }
 0x14e   :  { %v270_v13 = vpop.f32.mrf.mxu1 }
 0x154   :  { %v289_v16 = vld [vmem:[#allocation1 + $0x2] ss:$9 sm:$0xff] }
 0x155   :  { %315 = vst [vmem:[#allocation1] sm:$0xff] %v1595_v12  ;;  %v291_v17 = vadd.f32 %v289_v16, %v281_v15  ;;  %v1447_v15 = vld [vmem:[#allocation2 + $0x28] sm:$0xff]  ;;  %v1446_v16 = vld [vmem:[#allocation2 + $0x20] sm:$0xff] }
 0x156   :  { %647 = vmatpush.bf16.msrb.mxu0 %v1447_v15 }
 0x157   :  { %vm292_vm5 = vcmp.ge.f32.partialorder %v291_v17, 30.0  ;;  %v1202_v19 = vadd.f32 -30.0, %v291_v17 }
 0x158   :  { %v314_v20 = vsel %vm292_vm5, %v1595_v12, %v291_v17  ;;  %v1445_v17 = vld [vmem:[#allocation2 + $0x8] sm:$0xff] }
 0x159   :  { %v1203_v21 = vmul.f32 -1.442695, %v1202_v19  ;;  %321 = vst [vmem:[%s1718_s3 + $0x1] sm:$0x1] %v314_v20  ;;  %v1443_v19 = vld [vmem:[#allocation2 + $0x18] sm:$0xff] }
 0x15a   :  { %648 = vmatpush.bf16.msrb.mxu0 %v1446_v16 }
 0x15b   :  { %1478 = vpow2.f32 %v1203_v21  ;;  %v1441_v21 = vld [vmem:[#allocation2 + $0x30] sm:$0xff] }
 0x15c   :  { %v317_v22 = vld [vmem:[#allocation1 + $0x4] ss:$9 sm:$0xff] }
 0x15d   :  { %401 = vst [vmem:[#allocation1] sm:$0xff] %v1595_v12  ;;  %v319_v23 = vmul.f32 %v317_v22, %v191_v48  ;;  %v468_v22 = vld [vmem:[%s1717_s2 + $0x3] sm:$0x1] }
 0x15e   :  { %649 = vmatpush.bf16.msrb.mxu0 %v1445_v17 }
 0x15f   :  { %v320_v24 = vsel %vm292_vm5, 1.0, %v319_v23 }
 0x160   :  { %v322_v25 = vpack.c.bf16 %v320_v24, %v320_v24 }
 0x161   :  { %v1479_v26 = vpop.eup %1478 }
 0x162   :  { %v297_v27 = vadd.f32 1.0, %v1479_v26  ;;  %396 = vmatmul.bf16.vlgmr.msra.gmra.mxu2 %v322_v25  ;;  %650 = vmatpush.bf16.msrb.mxu0 %v1444_v18 }
 0x164   :  { %v403_v28 = vld [vmem:[#allocation1 + $0x1] ss:$9 sm:$0xff]  ;;  %1480 = vrcp.f32 %v297_v27  ;;  %v309_v32 = vand.u32 2147483648, %v297_v27  ;;  %v307_v34 = vand.u32 2147483647, %v297_v27  ;;  %vm303_vm7 = vweird.f32 %v297_v27 }
 0x165   :  { %406 = vst [vmem:[#allocation1] sm:$0xff] %v1595_v12  ;;  %v405_v53 = vmul.f32 %v403_v28, %v314_v20  ;;  %v1442_v20 = vld [vmem:[#allocation2] sm:$0xff] }
 0x166   :  { %v310_v36 = vor.u32 1.1754944e-38, %v309_v32  ;;  %vm308_vm9 = vcmp.eq.f32.partialorder %v307_v34, 8.507059e+37  ;;  %651 = vmatpush.bf16.msrb.mxu0 %v1443_v19 }
 0x16a   :  { %v1481_v29 = vpop.eup %1480  ;;  %652 = vmatpush.bf16.msrb.mxu0 %v1442_v20 }
 0x16b   :  { %v299_v30 = vmul.f32 %v1481_v29, %v297_v27  ;;  %vm304_vm6 = vweird.f32 %v1481_v29 }
 0x16c   :  { %vm305_vm8 = vmor %vm303_vm7, %vm304_vm6  ;;  %v408_v51 = vld [vmem:[#allocation1 + $0x3] ss:$9 sm:$0xff] }
 0x16d   :  { %v300_v31 = vsub.f32 1.0, %v299_v30  ;;  %v410_v54 = vadd.f32 %v408_v51, %v405_v53 }
 0x16e   :  { %653 = vmatpush.bf16.msrb.mxu0 %v1441_v21 }
 0x16f   :  { %v301_v33 = vmul.f32 %v1481_v29, %v300_v31 }
 0x171   :  { %v302_v35 = vadd.f32 %v1481_v29, %v301_v33  ;;  %v1456_v33 = vld [vmem:[#allocation2 + $0x38] sm:$0xff] }
 0x172   :  { %775 = vmatpush.bf16.msrb.mxu1 %v1456_v33  ;;  %v1460_v33 = vld [vmem:[#allocation2 + $0x10] sm:$0xff] }
 0x173   :  { %v306_v37 = vsel %vm305_vm8, %v1481_v29, %v302_v35 }
 0x174   :  { %v311_v38 = vsel %vm308_vm9, %v310_v36, %v306_v37 }
 0x175   :  { %313 = vst [vmem:[%s1719_s4 + $0x1] sm:$0x1] %v311_v38 }
 0x1e5   :  { %v397_v47 = vpop.f32.mrf.mxu2 }
 0x1e6   :  { %v398_v48 = vadd.f32 %v397_v47, %v339_v46 }
 0x1e8   :  { %v412_v49 = vrot.slane %v398_v48, 6 }
 0x1ea   :  { %v414_v50 = vmul.f32 %v412_v49, %v1595_v12 }
 0x1ec   :  { %416 = vst [vmem:[#allocation1] sm:$0xff] %v414_v50 }
 0x1ed   :  { %v399_v52 = vpop.f32.mrf.mxu2 }
 0x1f3   :  { %v418_v55 = vld [vmem:[#allocation1 + $0x2] ss:$9 sm:$0xff] }
 0x1f4   :  { %444 = vst [vmem:[#allocation1] sm:$0xff] %v1595_v12  ;;  %v420_v56 = vadd.f32 %v418_v55, %v410_v54  ;;  %v1455_v54 = vld [vmem:[#allocation2 + $0x28] sm:$0xff]  ;;  %v1454_v55 = vld [vmem:[#allocation2 + $0x20] sm:$0xff] }
 0x1f5   :  { %776 = vmatpush.bf16.msrb.mxu1 %v1455_v54 }
 0x1f6   :  { %vm421_vm10 = vcmp.ge.f32.partialorder %v420_v56, 30.0  ;;  %v1236_v58 = vadd.f32 -30.0, %v420_v56 }
 0x1f7   :  { %v443_v59 = vsel %vm421_vm10, %v1595_v12, %v420_v56  ;;  %v1453_v56 = vld [vmem:[#allocation2 + $0x8] sm:$0xff] }
 0x1f8   :  { %v1237_v60 = vmul.f32 -1.442695, %v1236_v58  ;;  %450 = vst [vmem:[%s1718_s3 + $0x2] sm:$0x1] %v443_v59  ;;  %v1451_v58 = vld [vmem:[#allocation2 + $0x18] sm:$0xff] }
 0x1f9   :  { %777 = vmatpush.bf16.msrb.mxu1 %v1454_v55 }
 0x1fa   :  { %1482 = vpow2.f32 %v1237_v60  ;;  %v1449_v60 = vld [vmem:[#allocation2 + $0x30] sm:$0xff] }
 0x1fb   :  { %v446_v61 = vld [vmem:[#allocation1 + $0x4] ss:$9 sm:$0xff] }
 0x1fc   :  { %v448_v62 = vmul.f32 %v446_v61, %v320_v24  ;;  %530 = vst [vmem:[#allocation1] sm:$0xff] %v1595_v12  ;;  %v597_v61 = vld [vmem:[%s1717_s2 + $0x4] sm:$0x1] }
 0x1fd   :  { %778 = vmatpush.bf16.msrb.mxu1 %v1453_v56 }
 0x1fe   :  { %v449_v63 = vsel %vm421_vm10, 1.0, %v448_v62 }
 0x1ff   :  { %v451_v0 = vpack.c.bf16 %v449_v63, %v449_v63 }
 0x200   :  { %v1483_v1 = vpop.eup %1482 }
 0x201   :  { %v426_v2 = vadd.f32 1.0, %v1483_v1  ;;  %525 = vmatmul.bf16.vlgmr.msra.gmra.mxu3 %v451_v0  ;;  %779 = vmatpush.bf16.msrb.mxu1 %v1452_v57 }
 0x203   :  { %1484 = vrcp.f32 %v426_v2  ;;  %v532_v3 = vld [vmem:[#allocation1 + $0x1] ss:$9 sm:$0xff]  ;;  %v438_v7 = vand.u32 2147483648, %v426_v2  ;;  %v436_v9 = vand.u32 2147483647, %v426_v2  ;;  %vm432_vm12 = vweird.f32 %v426_v2 }
 0x204   :  { %535 = vst [vmem:[#allocation1] sm:$0xff] %v1595_v12  ;;  %v534_v29 = vmul.f32 %v532_v3, %v443_v59  ;;  %v1450_v59 = vld [vmem:[#allocation2] sm:$0xff] }
 0x205   :  { %v439_v11 = vor.u32 1.1754944e-38, %v438_v7  ;;  %vm437_vm14 = vcmp.eq.f32.partialorder %v436_v9, 8.507059e+37  ;;  %780 = vmatpush.bf16.msrb.mxu1 %v1451_v58 }
 0x209   :  { %v1485_v4 = vpop.eup %1484  ;;  %781 = vmatpush.bf16.msrb.mxu1 %v1450_v59 }
 0x20a   :  { %v428_v5 = vmul.f32 %v1485_v4, %v426_v2  ;;  %vm433_vm11 = vweird.f32 %v1485_v4 }
 0x20b   :  { %vm434_vm13 = vmor %vm432_vm12, %vm433_vm11  ;;  %v537_v27 = vld [vmem:[#allocation1 + $0x3] ss:$9 sm:$0xff] }
 0x20c   :  { %v429_v6 = vsub.f32 1.0, %v428_v5  ;;  %v539_v30 = vadd.f32 %v537_v27, %v534_v29 }
 0x20d   :  { %782 = vmatpush.bf16.msrb.mxu1 %v1449_v60 }
 0x20e   :  { %v430_v8 = vmul.f32 %v1485_v4, %v429_v6 }
 0x210   :  { %v431_v10 = vadd.f32 %v1485_v4, %v430_v8  ;;  %v1464_v8 = vld [vmem:[#allocation2 + $0x38] sm:$0xff] }
 0x211   :  { %904 = vmatpush.bf16.msrb.mxu2 %v1464_v8  ;;  %v1468_v8 = vld [vmem:[#allocation2 + $0x10] sm:$0xff] }
 0x212   :  { %v435_v13 = vsel %vm434_vm13, %v1485_v4, %v431_v10 }
 0x213   :  { %v440_v14 = vsel %vm437_vm14, %v439_v11, %v435_v13 }
 0x214   :  { %442 = vst [vmem:[%s1719_s4 + $0x2] sm:$0x1] %v440_v14 }
 0x284   :  { %v526_v23 = vpop.f32.mrf.mxu3 }
 0x285   :  { %v527_v24 = vadd.f32 %v526_v23, %v468_v22 }
 0x287   :  { %v541_v25 = vrot.slane %v527_v24, 6 }
 0x289   :  { %v543_v26 = vmul.f32 %v541_v25, %v1595_v12 }
 0x28b   :  { %545 = vst [vmem:[#allocation1] sm:$0xff] %v543_v26 }
 0x28c   :  { %v528_v28 = vpop.f32.mrf.mxu3 }
 0x292   :  { %v547_v31 = vld [vmem:[#allocation1 + $0x2] ss:$9 sm:$0xff] }
 0x293   :  { %v549_v32 = vadd.f32 %v547_v31, %v539_v30  ;;  %573 = vst [vmem:[#allocation1] sm:$0xff] %v1595_v12  ;;  %v1463_v30 = vld [vmem:[#allocation2 + $0x28] sm:$0xff]  ;;  %v1462_v31 = vld [vmem:[#allocation2 + $0x20] sm:$0xff] }
 0x294   :  { %905 = vmatpush.bf16.msrb.mxu2 %v1463_v30 }
 0x295   :  { %vm550_vm15 = vcmp.ge.f32.partialorder %v549_v32, 30.0  ;;  %v1270_v34 = vadd.f32 -30.0, %v549_v32 }
 0x296   :  { %v572_v35 = vsel %vm550_vm15, %v1595_v12, %v549_v32  ;;  %v1461_v32 = vld [vmem:[#allocation2 + $0x8] sm:$0xff] }
 0x297   :  { %v1271_v36 = vmul.f32 -1.442695, %v1270_v34  ;;  %579 = vst [vmem:[%s1718_s3 + $0x3] sm:$0x1] %v572_v35  ;;  %v1459_v34 = vld [vmem:[#allocation2 + $0x18] sm:$0xff] }
 0x298   :  { %906 = vmatpush.bf16.msrb.mxu2 %v1462_v31 }
 0x299   :  { %1486 = vpow2.f32 %v1271_v36  ;;  %v1457_v36 = vld [vmem:[#allocation2 + $0x30] sm:$0xff] }
 0x29a   :  { %v575_v37 = vld [vmem:[#allocation1 + $0x4] ss:$9 sm:$0xff] }
 0x29b   :  { %v577_v38 = vmul.f32 %v575_v37, %v449_v63  ;;  %659 = vst [vmem:[#allocation1] sm:$0xff] %v1595_v12  ;;  %v726_v37 = vld [vmem:[%s1717_s2 + $0x5] sm:$0x1] }
 0x29c   :  { %907 = vmatpush.bf16.msrb.mxu2 %v1461_v32 }
 0x29d   :  { %v578_v39 = vsel %vm550_vm15, 1.0, %v577_v38 }
 0x29e   :  { %v580_v40 = vpack.c.bf16 %v578_v39, %v578_v39 }
 0x29f   :  { %v1487_v41 = vpop.eup %1486 }
 0x2a0   :  { %v555_v42 = vadd.f32 1.0, %v1487_v41  ;;  %654 = vmatmul.bf16.vlgmr.msrb.gmra.mxu0 %v580_v40  ;;  %908 = vmatpush.bf16.msrb.mxu2 %v1460_v33 }
 0x2a2   :  { %1488 = vrcp.f32 %v555_v42  ;;  %v661_v43 = vld [vmem:[#allocation1 + $0x1] ss:$9 sm:$0xff]  ;;  %v567_v47 = vand.u32 2147483648, %v555_v42  ;;  %v565_v49 = vand.u32 2147483647, %v555_v42  ;;  %vm561_vm1 = vweird.f32 %v555_v42 }
 0x2a3   :  { %664 = vst [vmem:[#allocation1] sm:$0xff] %v1595_v12  ;;  %v663_v4 = vmul.f32 %v661_v43, %v572_v35  ;;  %v1458_v35 = vld [vmem:[#allocation2] sm:$0xff] }
 0x2a4   :  { %v568_v51 = vor.u32 1.1754944e-38, %v567_v47  ;;  %vm566_vm3 = vcmp.eq.f32.partialorder %v565_v49, 8.507059e+37  ;;  %909 = vmatpush.bf16.msrb.mxu2 %v1459_v34 }
 0x2a8   :  { %v1489_v44 = vpop.eup %1488  ;;  %910 = vmatpush.bf16.msrb.mxu2 %v1458_v35 }
 0x2a9   :  { %v557_v45 = vmul.f32 %v1489_v44, %v555_v42  ;;  %vm562_vm0 = vweird.f32 %v1489_v44 }
 0x2aa   :  { %vm563_vm2 = vmor %vm561_vm1, %vm562_vm0  ;;  %v666_v2 = vld [vmem:[#allocation1 + $0x3] ss:$9 sm:$0xff] }
 0x2ab   :  { %v558_v46 = vsub.f32 1.0, %v557_v45  ;;  %v668_v5 = vadd.f32 %v666_v2, %v663_v4 }
 0x2ac   :  { %911 = vmatpush.bf16.msrb.mxu2 %v1457_v36 }
 0x2ad   :  { %v559_v48 = vmul.f32 %v1489_v44, %v558_v46 }
 0x2af   :  { %v560_v50 = vadd.f32 %v1489_v44, %v559_v48  ;;  %v1472_v48 = vld [vmem:[#allocation2 + $0x38] sm:$0xff] }
 0x2b0   :  { %1033 = vmatpush.bf16.msrb.mxu3 %v1472_v48 }
 0x2b1   :  { %v564_v52 = vsel %vm563_vm2, %v1489_v44, %v560_v50 }
 0x2b2   :  { %v569_v53 = vsel %vm566_vm3, %v568_v51, %v564_v52 }
 0x2b3   :  { %571 = vst [vmem:[%s1719_s4 + $0x3] sm:$0x1] %v569_v53 }
 0x31d   :  { %v655_v62 = vpop.f32.mrf.mxu0 }
 0x31e   :  { %v656_v63 = vadd.f32 %v655_v62, %v597_v61 }
 0x320   :  { %v670_v0 = vrot.slane %v656_v63, 6 }
 0x322   :  { %v672_v1 = vmul.f32 %v670_v0, %v1595_v12 }
 0x324   :  { %674 = vst [vmem:[#allocation1] sm:$0xff] %v672_v1 }
 0x325   :  { %v657_v3 = vpop.f32.mrf.mxu0 }
 0x32b   :  { %v676_v6 = vld [vmem:[#allocation1 + $0x2] ss:$9 sm:$0xff] }
 0x32c   :  { %v678_v7 = vadd.f32 %v676_v6, %v668_v5  ;;  %702 = vst [vmem:[#allocation1] sm:$0xff] %v1595_v12  ;;  %v1471_v5 = vld [vmem:[#allocation2 + $0x28] sm:$0xff]  ;;  %v1470_v6 = vld [vmem:[#allocation2 + $0x20] sm:$0xff] }
 0x32d   :  { %1034 = vmatpush.bf16.msrb.mxu3 %v1471_v5 }
 0x32e   :  { %vm679_vm4 = vcmp.ge.f32.partialorder %v678_v7, 30.0  ;;  %v1304_v9 = vadd.f32 -30.0, %v678_v7 }
 0x32f   :  { %v701_v10 = vsel %vm679_vm4, %v1595_v12, %v678_v7  ;;  %v1469_v7 = vld [vmem:[#allocation2 + $0x8] sm:$0xff] }
 0x330   :  { %v1305_v11 = vmul.f32 -1.442695, %v1304_v9  ;;  %708 = vst [vmem:[%s1718_s3 + $0x4] sm:$0x1] %v701_v10  ;;  %v1467_v9 = vld [vmem:[#allocation2 + $0x18] sm:$0xff] }
 0x331   :  { %1035 = vmatpush.bf16.msrb.mxu3 %v1470_v6 }
 0x332   :  { %1490 = vpow2.f32 %v1305_v11  ;;  %v1465_v11 = vld [vmem:[#allocation2 + $0x30] sm:$0xff] }
 0x333   :  { %v704_v13 = vld [vmem:[#allocation1 + $0x4] ss:$9 sm:$0xff] }
 0x334   :  { %v706_v14 = vmul.f32 %v704_v13, %v578_v39  ;;  %788 = vst [vmem:[#allocation1] sm:$0xff] %v1595_v12  ;;  %v855_v13 = vld [vmem:[%s1717_s2 + $0x6] sm:$0x1] }
 0x335   :  { %1036 = vmatpush.bf16.msrb.mxu3 %v1469_v7 }
 0x336   :  { %v707_v15 = vsel %vm679_vm4, 1.0, %v706_v14 }
 0x337   :  { %v709_v16 = vpack.c.bf16 %v707_v15, %v707_v15 }
 0x338   :  { %v1491_v17 = vpop.eup %1490 }
 0x339   :  { %v684_v18 = vadd.f32 1.0, %v1491_v17  ;;  %783 = vmatmul.bf16.vlgmr.msrb.gmra.mxu1 %v709_v16  ;;  %1037 = vmatpush.bf16.msrb.mxu3 %v1468_v8 }
 0x33b   :  { %1492 = vrcp.f32 %v684_v18  ;;  %v790_v19 = vld [vmem:[#allocation1 + $0x1] ss:$9 sm:$0xff]  ;;  %v696_v23 = vand.u32 2147483648, %v684_v18  ;;  %v694_v25 = vand.u32 2147483647, %v684_v18  ;;  %vm690_vm6 = vweird.f32 %v684_v18 }
 0x33c   :  { %793 = vst [vmem:[#allocation1] sm:$0xff] %v1595_v12  ;;  %v792_v44 = vmul.f32 %v790_v19, %v701_v10  ;;  %v1466_v10 = vld [vmem:[#allocation2] sm:$0xff] }
 0x33d   :  { %v697_v27 = vor.u32 1.1754944e-38, %v696_v23  ;;  %vm695_vm8 = vcmp.eq.f32.partialorder %v694_v25, 8.507059e+37  ;;  %1038 = vmatpush.bf16.msrb.mxu3 %v1467_v9 }
 0x341   :  { %v1493_v20 = vpop.eup %1492  ;;  %1039 = vmatpush.bf16.msrb.mxu3 %v1466_v10 }
 0x342   :  { %v686_v21 = vmul.f32 %v1493_v20, %v684_v18  ;;  %vm691_vm5 = vweird.f32 %v1493_v20 }
 0x343   :  { %vm692_vm7 = vmor %vm690_vm6, %vm691_vm5  ;;  %v795_v42 = vld [vmem:[#allocation1 + $0x3] ss:$9 sm:$0xff] }
 0x344   :  { %v687_v22 = vsub.f32 1.0, %v686_v21  ;;  %v797_v45 = vadd.f32 %v795_v42, %v792_v44  ;;  %v984_v44 = vld [vmem:[%s1717_s2 + $0x7] sm:$0x1] }
 0x345   :  { %1040 = vmatpush.bf16.msrb.mxu3 %v1465_v11 }
 0x346   :  { %v688_v24 = vmul.f32 %v1493_v20, %v687_v22 }
 0x348   :  { %v689_v26 = vadd.f32 %v1493_v20, %v688_v24 }
 0x34a   :  { %v693_v28 = vsel %vm692_vm7, %v1493_v20, %v689_v26 }
 0x34b   :  { %v698_v29 = vsel %vm695_vm8, %v697_v27, %v693_v28 }
 0x34c   :  { %700 = vst [vmem:[%s1719_s4 + $0x4] sm:$0x1] %v698_v29 }
 0x3b6   :  { %v784_v38 = vpop.f32.mrf.mxu1 }
 0x3b7   :  { %v785_v39 = vadd.f32 %v784_v38, %v726_v37 }
 0x3b9   :  { %v799_v40 = vrot.slane %v785_v39, 6 }
 0x3bb   :  { %v801_v41 = vmul.f32 %v799_v40, %v1595_v12 }
 0x3bd   :  { %803 = vst [vmem:[#allocation1] sm:$0xff] %v801_v41 }
 0x3be   :  { %v786_v43 = vpop.f32.mrf.mxu1 }
 0x3c4   :  { %v805_v46 = vld [vmem:[#allocation1 + $0x2] ss:$9 sm:$0xff] }
 0x3c5   :  { %v807_v47 = vadd.f32 %v805_v46, %v797_v45  ;;  %831 = vst [vmem:[#allocation1] sm:$0xff] %v1595_v12 }
 0x3c7   :  { %vm808_vm9 = vcmp.ge.f32.partialorder %v807_v47, 30.0  ;;  %v1338_v49 = vadd.f32 -30.0, %v807_v47 }
 0x3c8   :  { %v830_v50 = vsel %vm808_vm9, %v1595_v12, %v807_v47 }
 0x3c9   :  { %v1339_v51 = vmul.f32 -1.442695, %v1338_v49  ;;  %837 = vst [vmem:[%s1718_s3 + $0x5] sm:$0x1] %v830_v50 }
 0x3cb   :  { %1494 = vpow2.f32 %v1339_v51 }
 0x3cc   :  { %v833_v52 = vld [vmem:[#allocation1 + $0x4] ss:$9 sm:$0xff] }
 0x3cd   :  { %v835_v53 = vmul.f32 %v833_v52, %v707_v15  ;;  %917 = vst [vmem:[#allocation1] sm:$0xff] %v1595_v12 }
 0x3cf   :  { %v836_v54 = vsel %vm808_vm9, 1.0, %v835_v53 }
 0x3d0   :  { %v838_v55 = vpack.c.bf16 %v836_v54, %v836_v54 }
 0x3d1   :  { %v1495_v56 = vpop.eup %1494 }
 0x3d2   :  { %v813_v57 = vadd.f32 1.0, %v1495_v56  ;;  %912 = vmatmul.bf16.vlgmr.msrb.gmra.mxu2 %v838_v55 }
 0x3d4   :  { %1496 = vrcp.f32 %v813_v57  ;;  %v919_v58 = vld [vmem:[#allocation1 + $0x1] ss:$9 sm:$0xff]  ;;  %v825_v62 = vand.u32 2147483648, %v813_v57  ;;  %v823_v0 = vand.u32 2147483647, %v813_v57  ;;  %vm819_vm11 = vweird.f32 %v813_v57 }
 0x3d5   :  { %922 = vst [vmem:[#allocation1] sm:$0xff] %v1595_v12  ;;  %v921_v20 = vmul.f32 %v919_v58, %v830_v50 }
 0x3d6   :  { %v826_v2 = vor.u32 1.1754944e-38, %v825_v62  ;;  %vm824_vm13 = vcmp.eq.f32.partialorder %v823_v0, 8.507059e+37 }
 0x3da   :  { %v1497_v59 = vpop.eup %1496 }
 0x3db   :  { %v815_v60 = vmul.f32 %v1497_v59, %v813_v57  ;;  %vm820_vm10 = vweird.f32 %v1497_v59 }
 0x3dc   :  { %vm821_vm12 = vmor %vm819_vm11, %vm820_vm10  ;;  %v924_v18 = vld [vmem:[#allocation1 + $0x3] ss:$9 sm:$0xff] }
 0x3dd   :  { %v816_v61 = vsub.f32 1.0, %v815_v60  ;;  %v926_v21 = vadd.f32 %v924_v18, %v921_v20 }
 0x3df   :  { %v817_v63 = vmul.f32 %v1497_v59, %v816_v61 }
 0x3e1   :  { %v818_v1 = vadd.f32 %v1497_v59, %v817_v63 }
 0x3e3   :  { %v822_v3 = vsel %vm821_vm12, %v1497_v59, %v818_v1 }
 0x3e4   :  { %v827_v4 = vsel %vm824_vm13, %v826_v2, %v822_v3 }
 0x3e5   :  { %829 = vst [vmem:[%s1719_s4 + $0x5] sm:$0x1] %v827_v4 }
 0x455   :  { %v913_v14 = vpop.f32.mrf.mxu2 }
 0x456   :  { %v914_v15 = vadd.f32 %v913_v14, %v855_v13 }
 0x458   :  { %v928_v16 = vrot.slane %v914_v15, 6 }
 0x45a   :  { %v930_v17 = vmul.f32 %v928_v16, %v1595_v12 }
 0x45c   :  { %932 = vst [vmem:[#allocation1] sm:$0xff] %v930_v17 }
 0x45d   :  { %v915_v19 = vpop.f32.mrf.mxu2 }
 0x463   :  { %v934_v22 = vld [vmem:[#allocation1 + $0x2] ss:$9 sm:$0xff] }
 0x464   :  { %v936_v23 = vadd.f32 %v934_v22, %v926_v21  ;;  %960 = vst [vmem:[#allocation1] sm:$0xff] %v1595_v12 }
 0x466   :  { %vm937_vm14 = vcmp.ge.f32.partialorder %v936_v23, 30.0  ;;  %v1372_v24 = vadd.f32 -30.0, %v936_v23 }
 0x467   :  { %v959_v25 = vsel %vm937_vm14, %v1595_v12, %v936_v23 }
 0x468   :  { %v1373_v26 = vmul.f32 -1.442695, %v1372_v24  ;;  %966 = vst [vmem:[%s1718_s3 + $0x6] sm:$0x1] %v959_v25 }
 0x46a   :  { %1498 = vpow2.f32 %v1373_v26 }
 0x46b   :  { %v962_v27 = vld [vmem:[#allocation1 + $0x4] ss:$9 sm:$0xff] }
 0x46c   :  { %v964_v28 = vmul.f32 %v962_v27, %v836_v54  ;;  %1046 = vst [vmem:[#allocation1] sm:$0xff] %v1595_v12 }
 0x46e   :  { %v965_v29 = vsel %vm937_vm14, 1.0, %v964_v28 }
 0x46f   :  { %v967_v30 = vpack.c.bf16 %v965_v29, %v965_v29 }
 0x470   :  { %v1499_v31 = vpop.eup %1498 }
 0x471   :  { %v942_v32 = vadd.f32 1.0, %v1499_v31  ;;  %1041 = vmatmul.bf16.vlgmr.msrb.gmra.mxu3 %v967_v30 }
 0x473   :  { %1500 = vrcp.f32 %v942_v32  ;;  %v1048_v33 = vld [vmem:[#allocation1 + $0x1] ss:$9 sm:$0xff]  ;;  %v954_v37 = vand.u32 2147483648, %v942_v32  ;;  %v952_v39 = vand.u32 2147483647, %v942_v32  ;;  %vm948_vm0 = vweird.f32 %v942_v32 }
 0x474   :  { %1051 = vst [vmem:[#allocation1] sm:$0xff] %v1595_v12  ;;  %v1050_v51 = vmul.f32 %v1048_v33, %v959_v25 }
 0x475   :  { %v955_v41 = vor.u32 1.1754944e-38, %v954_v37  ;;  %vm953_vm2 = vcmp.eq.f32.partialorder %v952_v39, 8.507059e+37 }
 0x479   :  { %v1501_v34 = vpop.eup %1500 }
 0x47a   :  { %v944_v35 = vmul.f32 %v1501_v34, %v942_v32  ;;  %vm949_vm15 = vweird.f32 %v1501_v34 }
 0x47b   :  { %vm950_vm1 = vmor %vm948_vm0, %vm949_vm15  ;;  %v1053_v49 = vld [vmem:[#allocation1 + $0x3] ss:$9 sm:$0xff] }
 0x47c   :  { %v945_v36 = vsub.f32 1.0, %v944_v35  ;;  %v1055_v52 = vadd.f32 %v1053_v49, %v1050_v51 }
 0x47e   :  { %v946_v38 = vmul.f32 %v1501_v34, %v945_v36 }
 0x480   :  { %v947_v40 = vadd.f32 %v1501_v34, %v946_v38 }
 0x482   :  { %v951_v42 = vsel %vm950_vm1, %v1501_v34, %v947_v40 }
 0x483   :  { %v956_v43 = vsel %vm953_vm2, %v955_v41, %v951_v42 }
 0x484   :  { %958 = vst [vmem:[%s1719_s4 + $0x6] sm:$0x1] %v956_v43 }
 0x4f4   :  { %v1042_v45 = vpop.f32.mrf.mxu3 }
 0x4f5   :  { %v1043_v46 = vadd.f32 %v1042_v45, %v984_v44 }
 0x4f7   :  { %v1057_v47 = vrot.slane %v1043_v46, 6 }
 0x4f9   :  { %v1059_v48 = vmul.f32 %v1057_v47, %v1595_v12 }
 0x4fb   :  { %1061 = vst [vmem:[#allocation1] sm:$0xff] %v1059_v48 }
 0x4fc   :  { %v1044_v50 = vpop.f32.mrf.mxu3 }
 0x502   :  { %v1063_v53 = vld [vmem:[#allocation1 + $0x2] ss:$9 sm:$0xff] }
 0x503   :  { %v1065_v54 = vadd.f32 %v1063_v53, %v1055_v52  ;;  %1089 = vst [vmem:[#allocation1] sm:$0xff] %v1595_v12 }
 0x505   :  { %vm1066_vm3 = vcmp.ge.f32.partialorder %v1065_v54, 30.0  ;;  %v1406_v55 = vadd.f32 -30.0, %v1065_v54 }
 0x506   :  { %v1088_v56 = vsel %vm1066_vm3, %v1595_v12, %v1065_v54 }
 0x507   :  { %v1407_v57 = vmul.f32 -1.442695, %v1406_v55  ;;  %1095 = vst [vmem:[%s1718_s3 + $0x7] sm:$0x1] %v1088_v56 }
 0x508   :  { %1096 = vst [vmem:[#allocation4] sm:$0x1] %v1088_v56 }
 0x509   :  { %1502 = vpow2.f32 %v1407_v57 }
 0x50a   :  { %v1091_v58 = vld [vmem:[#allocation1 + $0x4] ss:$9 sm:$0xff] }
 0x50b   :  { %v1093_v59 = vmul.f32 %v1091_v58, %v965_v29 }
 0x50d   :  { %v1094_v60 = vsel %vm1066_vm3, 1.0, %v1093_v59 }
 0x50e   :  { %1097 = vst [vmem:[#allocation5] sm:$0x1] %v1094_v60 }
 0x50f   :  { %v1503_v12 = vpop.eup %1502  ;;  %1101 = vst [vmem:[#allocation6] sm:$0x1] %v1094_v60 }
 0x510   :  { %v1071_v61 = vadd.f32 1.0, %v1503_v12  ;;  %1116 = dma.vmem_to_hbm [thread:$0]  %s1112_s7, 16, %s1114_s10, [#allocation7]  }
 0x512   :  { %1504 = vrcp.f32 %v1071_v61  ;;  %v1083_v1 = vand.u32 2147483648, %v1071_v61  ;;  %v1081_v3 = vand.u32 2147483647, %v1071_v61  ;;  %vm1077_vm5 = vweird.f32 %v1071_v61 }
 0x514   :  { %v1084_v5 = vor.u32 1.1754944e-38, %v1083_v1  ;;  %vm1082_vm7 = vcmp.eq.f32.partialorder %v1081_v3, 8.507059e+37 }
 0x518   :  { %v1505_v62 = vpop.eup %1504 }
 0x519   :  { %v1073_v63 = vmul.f32 %v1505_v62, %v1071_v61  ;;  %vm1078_vm4 = vweird.f32 %v1505_v62 }
 0x51a   :  { %vm1079_vm6 = vmor %vm1077_vm5, %vm1078_vm4 }
 0x51b   :  { %v1074_v0 = vsub.f32 1.0, %v1073_v63 }
 0x51d   :  { %v1075_v2 = vmul.f32 %v1505_v62, %v1074_v0 }
 0x51f   :  { %v1076_v4 = vadd.f32 %v1505_v62, %v1075_v2 }
 0x521   :  { %v1080_v6 = vsel %vm1079_vm6, %v1505_v62, %v1076_v4 }
 0x522   :  { %v1085_v7 = vsel %vm1082_vm7, %v1084_v5, %v1080_v6 }
 0x523   :  { %1087 = vst [vmem:[%s1719_s4 + $0x7] sm:$0x1] %v1085_v7 }
 0x524   :  { %1532 = dma.done.wait [#allocation7], 16  }
 0x525   :  { %1533 = vsyncadd [#allocation7], 4294967280 }
 0x526   :  { %1125 = vsyncpa [#allocation7], 1 }
 0x527   :  { %1126 = vsyncmov [#allocation3] }
 0x52a   :  { %s1127_s11 = vpop.sfrf %1126 }
 0x52b   :  { %p1408_p0 = scmp.ne.s32.totalorder %s1127_s11, 0 }
 0x52d   :  { %1131 = shalt.err (%p1408_p0)  }

</bundles_post_ra>
